<compile_context>
chip_gen: v6e
topology: v6e:2x2x1
jax: 0.10.0
libtpu: 0.0.40
codegen_flags: <defaults>
</compile_context>

<pallas_src>
import functools

import jax
import jax.numpy as jnp
from jax.experimental import pallas as pl
from jax.experimental.pallas import tpu as pltpu


def _round_up(x, m):
    return ((x + m - 1) // m) * m


def _cdiv(a, b):
    return -(-a // b)


def _mask_ce_kernel(logits_ref, golden_ref, loss_out_ref, cnt_out_ref,
                    loss_acc, cnt_acc, *, mask_ids, n_rows, tile_rows,
                    steps_per_chunk, total_tiles):
    c = pl.program_id(0)            # row-chunk index ("parallel" axis)
    i = pl.program_id(1)            # step within the chunk ("arbitrary" axis)
    tile_idx = c * steps_per_chunk + i

    @pl.when(i == 0)
    def _init():
        loss_acc[...] = jnp.zeros_like(loss_acc)
        cnt_acc[...] = jnp.zeros_like(cnt_acc)

    # Padded trailing steps (clamped logits index) do no work at all.
    @pl.when(tile_idx < total_tiles)
    def _compute():
        x = logits_ref[...]                          # (tile_rows, V) native dt
        g = golden_ref[...]                          # (tile_rows, 1) int32
        V = x.shape[-1]

        # Numerically stable CE.  max() is exact in bf16 so take it in the
        # native dtype; the subtraction / exp / sums run in f32.
        row_max = jnp.max(x, axis=-1, keepdims=True).astype(jnp.float32)
        shifted = x.astype(jnp.float32) - row_max    # (tile_rows, V) f32
        denom = jnp.sum(jnp.exp(shifted), axis=-1, keepdims=True)

        # (1, V) iota broadcast against (tile_rows, 1) labels — no full-tile
        # int32 temporary.
        col = jax.lax.broadcasted_iota(jnp.int32, (1, V), 1)
        tgt_shifted = jnp.sum(jnp.where(col == g, shifted, 0.0), axis=-1,
                              keepdims=True)
        ce = jnp.log(denom) - tgt_shifted            # (tile_rows, 1)

        # Row validity handles N not divisible by tile_rows.
        row_ids = (tile_idx * tile_rows
                   + jax.lax.broadcasted_iota(jnp.int32, (tile_rows, 1), 0))
        valid = row_ids < n_rows

        # mask_ids is a small compile-time tuple; for dozens+ of ids pass them
        # as an SMEM int32 array and compare-reduce instead of unrolling.
        masked = jnp.zeros_like(valid)
        for mid in mask_ids:
            masked = masked | (g == jnp.int32(mid))
        masked = masked & valid

        ce = jnp.where(valid & jnp.logical_not(masked), ce, 0.0)

        loss_acc[...] += jnp.sum(ce)
        cnt_acc[...] += jnp.sum(masked.astype(jnp.float32))

    @pl.when(i == pl.num_programs(1) - 1)
    def _store():
        loss_out_ref[...] = loss_acc[...]
        cnt_out_ref[...] = cnt_acc[...]


def mask_cross_entropy(logits, golden, mask_ids=(), *, tile_rows=None,
                       num_chunks=None):
    """logits: [N, V] float (f32 or bf16), golden: [N] int -> scalar f32."""
    N, V = logits.shape
    itemsize = jnp.dtype(logits.dtype).itemsize
    row_align = 16 if itemsize < 4 else 8

    # VMEM capacity query, conservative 64 MiB fallback (v7x per-core size).
    try:
        vmem_cap = int(pltpu.get_tpu_info().vmem_capacity_bytes)
    except Exception:  # noqa: BLE001 - query unavailable on some backends
        vmem_cap = 64 * 1024 * 1024
    small_vmem = vmem_cap <= (64 << 20)

    # Per-row resident bytes at steady state:
    #   2x double-buffered logits tile at the input itemsize
    # + ~4 full-tile f32 temporaries (upcast, shifted, exp, compare/select)
    # + 2x double-buffered golden row padded to a 128-lane int32 tile (512 B).
    per_row = 2 * V * itemsize + 4 * V * 4 + 2 * 512

    budget = (vmem_cap * 3) // 4
    if tile_rows is None:
        usable = max(budget - (4 << 20), 1 << 20)   # outputs / scratch / misc
        tile_rows = usable // per_row
        # Per-step overhead is amortized once the tile is a few MiB; huge
        # tiles only add VMEM pressure (esp. on 64 MiB v7x).
        tile_rows = min(tile_rows, 512 if small_vmem else 2048)
    tile_rows = max(row_align, _round_up(int(tile_rows), row_align))
    tile_rows = min(tile_rows, _round_up(N, row_align))

    total_tiles = _cdiv(N, tile_rows)

    if num_chunks is None:
        target_chunk_rows = max(tile_rows, 4096)
        num_chunks = _cdiv(N, target_chunk_rows)
    num_chunks = max(1, int(num_chunks))
    if total_tiles >= 2:
        num_chunks = max(2, min(num_chunks, total_tiles))
        if num_chunks % 2:       # even split across v7x's two TensorCores
            num_chunks += 1
    else:
        num_chunks = 1
    steps_per_chunk = _cdiv(total_tiles, num_chunks)
    # Padded / empty trailing steps are skipped in-kernel and (thanks to the
    # clamped index map) cause no extra HBM reads.

    golden2d = golden.astype(jnp.int32).reshape(N, 1)

    last_tile = total_tiles - 1

    def tile_index(c, i, s=steps_per_chunk, lt=last_tile):
        # Clamp so padded trailing steps point at the last real tile (no new
        # DMA since the block index does not change); their compute is gated
        # off inside the kernel.
        return (jnp.minimum(c * s + i, lt), 0)

    kernel = functools.partial(
        _mask_ce_kernel,
        mask_ids=tuple(int(m) for m in mask_ids),
        n_rows=N, tile_rows=tile_rows, steps_per_chunk=steps_per_chunk,
        total_tiles=total_tiles)

    vmem_need = tile_rows * per_row + (2 << 20)     # + scratch/outputs slack
    vmem_limit = int(min(max(vmem_need, 16 << 20), (vmem_cap * 9) // 10))

    cost = pl.CostEstimate(
        flops=6 * N * V,
        transcendentals=N * V + N,
        bytes_accessed=N * V * itemsize + N * 512 + num_chunks * 8)

    loss_parts, cnt_parts = pl.pallas_call(
        kernel,
        out_shape=(
            jax.ShapeDtypeStruct((num_chunks, 1, 1), jnp.float32),
            jax.ShapeDtypeStruct((num_chunks, 1, 1), jnp.float32),
        ),
        grid_spec=pltpu.PrefetchScalarGridSpec(
            num_scalar_prefetch=0,
            grid=(num_chunks, steps_per_chunk),
            in_specs=[
                pl.BlockSpec((tile_rows, V), tile_index),
                pl.BlockSpec((tile_rows, 1), tile_index),
            ],
            out_specs=(
                pl.BlockSpec((None, 1, 1), lambda c, i: (c, 0, 0)),
                pl.BlockSpec((None, 1, 1), lambda c, i: (c, 0, 0)),
            ),
            scratch_shapes=[
                pltpu.VMEM((1, 1), jnp.float32),
                pltpu.VMEM((1, 1), jnp.float32),
            ],
        ),
        compiler_params=pltpu.CompilerParams(
            dimension_semantics=("parallel", "arbitrary"),
            vmem_limit_bytes=vmem_limit),
        cost_estimate=cost,
    )(logits, golden2d)

    # Tiny final reduction + division in plain JAX; summing per-chunk partials
    # here also improves f32 accumulation for large N.
    loss_sum = jnp.sum(loss_parts)
    mask_sum = jnp.sum(cnt_parts)
    # NOTE: matches PyTorch semantics — no clamp, all-masked input -> inf/nan.
    return (loss_sum / (jnp.float32(N) - mask_sum)).astype(jnp.float32)


def _reference(logits, golden, mask_ids):
    """Plain-JAX reference mirroring the PyTorch module."""
    logits = logits.astype(jnp.float32)
    logp = jax.nn.log_softmax(logits, axis=-1)
    ce = -jnp.take_along_axis(logp, golden[:, None].astype(jnp.int32),
                              axis=-1)[:, 0]
    mask = jnp.zeros_like(golden, dtype=jnp.bool_)
    for mid in mask_ids:
        mask = mask | (golden == mid)
    ce = jnp.where(mask, 0.0, ce)
    n = jnp.float32(golden.shape[0])
    return jnp.sum(ce) / (n - jnp.sum(mask.astype(jnp.float32)))


if __name__ == "__main__":
    key = jax.random.PRNGKey(0)
    k1, k2, k3, k4 = jax.random.split(key, 4)

    mask_ids = [0, 3]

    # Case 1: toy shape -> single tile / single chunk / single grid step.
    N, V = 128, 32
    logits = jax.random.normal(k1, (N, V), dtype=jnp.float32)
    golden = jax.random.randint(k2, (N,), 0, V, dtype=jnp.int32)
    loss = jax.block_until_ready(mask_cross_entropy(logits, golden, mask_ids))
    ref = _reference(logits, golden, mask_ids)
    assert jnp.allclose(loss, ref, rtol=1e-5, atol=1e-5), (loss, ref)

    # Case 2: ragged N with a forced multi-chunk, multi-step grid — exercises
    # the parallel chunk axis, the clamped/skipped padded trailing steps and
    # the row-validity masking of out-of-bounds tail rows.
    N2, V2 = 116, 32
    logits2 = jax.random.normal(k3, (N2, V2), dtype=jnp.float32)
    golden2 = jax.random.randint(k4, (N2,), 0, V2, dtype=jnp.int32)
    loss2 = jax.block_until_ready(
        mask_cross_entropy(logits2, golden2, mask_ids, tile_rows=24,
                           num_chunks=2))
    ref2 = _reference(logits2, golden2, mask_ids)
    assert jnp.allclose(loss2, ref2, rtol=1e-5, atol=1e-5), (loss2, ref2)

    # Case 3: bf16 logits (halves HBM traffic; exp/sum math stays in f32).
    logits_bf16 = logits.astype(jnp.bfloat16)
    loss3 = jax.block_until_ready(
        mask_cross_entropy(logits_bf16, golden, mask_ids))
    ref3 = _reference(logits_bf16, golden, mask_ids)
    assert jnp.allclose(loss3, ref3, rtol=1e-4, atol=1e-4), (loss3, ref3)

    print("KERNEL_OK")
</pallas_src>

<mosaic_0001>
module attributes {stable_mosaic.version = 11 : i64} {
  func.func @_mask_ce_kernel(%arg0: i32, %arg1: i32, %arg2: memref<128x32xf32, #tpu.memory_space<vmem>>, %arg3: memref<128x1xi32, #tpu.memory_space<vmem>>, %arg4: memref<1x1x1xf32, #tpu.memory_space<vmem>>, %arg5: memref<1x1x1xf32, #tpu.memory_space<vmem>>, %arg6: memref<1x1xf32, #tpu.memory_space<vmem>>, %arg7: memref<1x1xf32, #tpu.memory_space<vmem>>) attributes {dimension_semantics = [#tpu.dimension_semantics<parallel>, #tpu.dimension_semantics<arbitrary>], iteration_bounds = array<i64: 1, 1>, scalar_prefetch = 0 : i64, scratch_operands = 2 : i64, tpu.core_type = #tpu.core_type<tc>, window_params = [{transform_indices = @transform_0, window_bounds = array<i64: 128, 32>}, {transform_indices = @transform_1, window_bounds = array<i64: 128, 1>}, {transform_indices = @transform_2, window_bounds = array<i64: 1, 1, 1>}, {transform_indices = @transform_3, window_bounds = array<i64: 1, 1, 1>}]} {
    %c1_i32 = arith.constant 1 : i32
    %0 = arith.muli %arg0, %c1_i32 : i32
    %1 = arith.addi %0, %arg1 : i32
    %c0_i32 = arith.constant 0 : i32
    %2 = arith.cmpi eq, %arg1, %c0_i32 : i32
    %3 = arith.extui %2 : i1 to i32
    %c0_i32_0 = arith.constant 0 : i32
    %4 = arith.cmpi ne, %3, %c0_i32_0 : i32
    scf.if %4 {
      %cst = arith.constant 0.000000e+00 : f32
      %11 = vector.broadcast %cst : f32 to vector<1x1xf32>
      %c0 = arith.constant 0 : index
      %c0_5 = arith.constant 0 : index
      %12 = vector.load %arg6[%c0, %c0_5] : memref<1x1xf32, #tpu.memory_space<vmem>>, vector<1x1xf32>
      tpu.vector_store %arg6[%c0, %c0_5], %11 {strides = array<i32>} : memref<1x1xf32, #tpu.memory_space<vmem>>, vector<1x1xf32>,
      %cst_6 = arith.constant 0.000000e+00 : f32
      %13 = vector.broadcast %cst_6 : f32 to vector<1x1xf32>
      %c0_7 = arith.constant 0 : index
      %c0_8 = arith.constant 0 : index
      %14 = vector.load %arg7[%c0_7, %c0_8] : memref<1x1xf32, #tpu.memory_space<vmem>>, vector<1x1xf32>
      tpu.vector_store %arg7[%c0_7, %c0_8], %13 {strides = array<i32>} : memref<1x1xf32, #tpu.memory_space<vmem>>, vector<1x1xf32>,
    } else {
    }
    %c1_i32_1 = arith.constant 1 : i32
    %5 = arith.cmpi slt, %1, %c1_i32_1 : i32
    %6 = arith.extui %5 : i1 to i32
    %c0_i32_2 = arith.constant 0 : i32
    %7 = arith.cmpi ne, %6, %c0_i32_2 : i32
    scf.if %7 {
      %c0 = arith.constant 0 : index
      %c0_5 = arith.constant 0 : index
      %11 = vector.load %arg2[%c0, %c0_5] : memref<128x32xf32, #tpu.memory_space<vmem>>, vector<128x32xf32>
      %c0_6 = arith.constant 0 : index
      %c0_7 = arith.constant 0 : index
      %12 = vector.load %arg3[%c0_6, %c0_7] : memref<128x1xi32, #tpu.memory_space<vmem>>, vector<128x1xi32>
      %cst = arith.constant dense<0xFF800000> : vector<128xf32>
      %13 = vector.multi_reduction <maximumf>, %11, %cst [1] : vector<128x32xf32> to vector<128xf32>
      %14 = vector.shape_cast %13 : vector<128xf32> to vector<128x1xf32>
      %15 = vector.broadcast %14 : vector<128x1xf32> to vector<128x32xf32>
      %16 = arith.subf %11, %15 : vector<128x32xf32>
      %17 = math.exp %16 : vector<128x32xf32>
      %cst_8 = arith.constant dense<0.000000e+00> : vector<128xf32>
      %18 = vector.multi_reduction <add>, %17, %cst_8 [1] : vector<128x32xf32> to vector<128xf32>
      %19 = vector.shape_cast %18 : vector<128xf32> to vector<128x1xf32>
      %20 = tpu.iota {dimensions = array<i32: 1>} : vector<1x32xi32>
      %21 = vector.broadcast %20 : vector<1x32xi32> to vector<128x32xi32>
      %22 = vector.broadcast %12 : vector<128x1xi32> to vector<128x32xi32>
      %23 = arith.cmpi eq, %21, %22 : vector<128x32xi32>
      %cst_9 = arith.constant 0.000000e+00 : f32
      %24 = vector.broadcast %cst_9 : f32 to vector<128x32xf32>
      %25 = arith.select %23, %16, %24 : vector<128x32xi1>, vector<128x32xf32>
      %cst_10 = arith.constant dense<0.000000e+00> : vector<128xf32>
      %26 = vector.multi_reduction <add>, %25, %cst_10 [1] : vector<128x32xf32> to vector<128xf32>
      %27 = vector.shape_cast %26 : vector<128xf32> to vector<128x1xf32>
      %28 = math.log %19 : vector<128x1xf32>
      %29 = arith.subf %28, %27 : vector<128x1xf32>
      %c128_i32 = arith.constant 128 : i32
      %30 = arith.muli %1, %c128_i32 : i32
      %31 = tpu.iota {dimensions = array<i32: 0>} : vector<128x1xi32>
      %32 = vector.broadcast %30 : i32 to vector<128x1xi32>
      %33 = arith.addi %32, %31 : vector<128x1xi32>
      %c128_i32_11 = arith.constant 128 : i32
      %34 = vector.broadcast %c128_i32_11 : i32 to vector<128x1xi32>
      %35 = arith.cmpi slt, %33, %34 : vector<128x1xi32>
      %false = arith.constant false
      %36 = vector.broadcast %false : i1 to vector<128x1xi1>
      %c0_i32_12 = arith.constant 0 : i32
      %37 = vector.broadcast %c0_i32_12 : i32 to vector<128x1xi32>
      %38 = arith.cmpi eq, %12, %37 : vector<128x1xi32>
      %39 = arith.ori %36, %38 : vector<128x1xi1>
      %c3_i32 = arith.constant 3 : i32
      %40 = vector.broadcast %c3_i32 : i32 to vector<128x1xi32>
      %41 = arith.cmpi eq, %12, %40 : vector<128x1xi32>
      %42 = arith.ori %39, %41 : vector<128x1xi1>
      %43 = arith.andi %42, %35 : vector<128x1xi1>
      %cst_13 = arith.constant dense<true> : vector<128x1xi1>
      %44 = arith.xori %43, %cst_13 : vector<128x1xi1>
      %45 = arith.andi %35, %44 : vector<128x1xi1>
      %cst_14 = arith.constant 0.000000e+00 : f32
      %46 = vector.broadcast %cst_14 : f32 to vector<128x1xf32>
      %47 = arith.select %45, %29, %46 : vector<128x1xi1>, vector<128x1xf32>
      %c0_15 = arith.constant 0 : index
      %c0_16 = arith.constant 0 : index
      %48 = vector.load %arg6[%c0_15, %c0_16] : memref<1x1xf32, #tpu.memory_space<vmem>>, vector<1x1xf32>
      %49 = vector.shape_cast %47 : vector<128x1xf32> to vector<1x128x1xf32>
      %cst_17 = arith.constant dense<0.000000e+00> : vector<1xf32>
      %50 = vector.multi_reduction <add>, %49, %cst_17 [1, 2] : vector<1x128x1xf32> to vector<1xf32>
      %51 = vector.shape_cast %50 : vector<1xf32> to vector<1x1x1xf32>
      %52 = vector.extract %51[0, 0, 0] : f32 from vector<1x1x1xf32>
      %53 = vector.broadcast %52 : f32 to vector<1x1xf32>
      %54 = arith.addf %48, %53 : vector<1x1xf32>
      %c0_18 = arith.constant 0 : index
      %c0_19 = arith.constant 0 : index
      %55 = vector.load %arg6[%c0_18, %c0_19] : memref<1x1xf32, #tpu.memory_space<vmem>>, vector<1x1xf32>
      tpu.vector_store %arg6[%c0_18, %c0_19], %54 {strides = array<i32>} : memref<1x1xf32, #tpu.memory_space<vmem>>, vector<1x1xf32>,
      %c0_20 = arith.constant 0 : index
      %c0_21 = arith.constant 0 : index
      %56 = vector.load %arg7[%c0_20, %c0_21] : memref<1x1xf32, #tpu.memory_space<vmem>>, vector<1x1xf32>
      %57 = arith.extui %43 : vector<128x1xi1> to vector<128x1xi32>
      %58 = arith.sitofp %57 : vector<128x1xi32> to vector<128x1xf32>
      %59 = vector.shape_cast %58 : vector<128x1xf32> to vector<1x128x1xf32>
      %cst_22 = arith.constant dense<0.000000e+00> : vector<1xf32>
      %60 = vector.multi_reduction <add>, %59, %cst_22 [1, 2] : vector<1x128x1xf32> to vector<1xf32>
      %61 = vector.shape_cast %60 : vector<1xf32> to vector<1x1x1xf32>
      %62 = vector.extract %61[0, 0, 0] : f32 from vector<1x1x1xf32>
      %63 = vector.broadcast %62 : f32 to vector<1x1xf32>
      %64 = arith.addf %56, %63 : vector<1x1xf32>
      %c0_23 = arith.constant 0 : index
      %c0_24 = arith.constant 0 : index
      %65 = vector.load %arg7[%c0_23, %c0_24] : memref<1x1xf32, #tpu.memory_space<vmem>>, vector<1x1xf32>
      tpu.vector_store %arg7[%c0_23, %c0_24], %64 {strides = array<i32>} : memref<1x1xf32, #tpu.memory_space<vmem>>, vector<1x1xf32>,
    } else {
    }
    %c0_i32_3 = arith.constant 0 : i32
    %8 = arith.cmpi eq, %arg1, %c0_i32_3 : i32
    %9 = arith.extui %8 : i1 to i32
    %c0_i32_4 = arith.constant 0 : i32
    %10 = arith.cmpi ne, %9, %c0_i32_4 : i32
    scf.if %10 {
      %c0 = arith.constant 0 : index
      %c0_5 = arith.constant 0 : index
      %11 = vector.load %arg6[%c0, %c0_5] : memref<1x1xf32, #tpu.memory_space<vmem>>, vector<1x1xf32>
      %c0_6 = arith.constant 0 : index
      %c0_7 = arith.constant 0 : index
      %c0_8 = arith.constant 0 : index
      %12 = vector.load %arg4[%c0_6, %c0_7, %c0_8] : memref<1x1x1xf32, #tpu.memory_space<vmem>>, vector<1x1x1xf32>
      %13 = vector.shape_cast %12 : vector<1x1x1xf32> to vector<1x1xf32>
      %14 = vector.shape_cast %11 : vector<1x1xf32> to vector<1x1x1xf32>
      tpu.vector_store %arg4[%c0_6, %c0_7, %c0_8], %14 {strides = array<i32>} : memref<1x1x1xf32, #tpu.memory_space<vmem>>, vector<1x1x1xf32>,
      %c0_9 = arith.constant 0 : index
      %c0_10 = arith.constant 0 : index
      %15 = vector.load %arg7[%c0_9, %c0_10] : memref<1x1xf32, #tpu.memory_space<vmem>>, vector<1x1xf32>
      %c0_11 = arith.constant 0 : index
      %c0_12 = arith.constant 0 : index
      %c0_13 = arith.constant 0 : index
      %16 = vector.load %arg5[%c0_11, %c0_12, %c0_13] : memref<1x1x1xf32, #tpu.memory_space<vmem>>, vector<1x1x1xf32>
      %17 = vector.shape_cast %16 : vector<1x1x1xf32> to vector<1x1xf32>
      %18 = vector.shape_cast %15 : vector<1x1xf32> to vector<1x1x1xf32>
      tpu.vector_store %arg5[%c0_11, %c0_12, %c0_13], %18 {strides = array<i32>} : memref<1x1x1xf32, #tpu.memory_space<vmem>>, vector<1x1x1xf32>,
    } else {
    }
    return
  }
  func.func @transform_0(%arg0: i32, %arg1: i32) -> (i32, i32) {
    %c1_i32 = arith.constant 1 : i32
    %0 = arith.muli %arg0, %c1_i32 : i32
    %1 = arith.addi %0, %arg1 : i32
    %c0_i32 = arith.constant 0 : i32
    %2 = arith.minsi %1, %c0_i32 : i32
    %c0_i32_0 = arith.constant 0 : i32
    %c0_i32_1 = arith.constant 0 : i32
    return %2, %c0_i32_0 : i32, i32
  }
  func.func @transform_1(%arg0: i32, %arg1: i32) -> (i32, i32) {
    %c1_i32 = arith.constant 1 : i32
    %0 = arith.muli %arg0, %c1_i32 : i32
    %1 = arith.addi %0, %arg1 : i32
    %c0_i32 = arith.constant 0 : i32
    %2 = arith.minsi %1, %c0_i32 : i32
    %c0_i32_0 = arith.constant 0 : i32
    %c0_i32_1 = arith.constant 0 : i32
    return %2, %c0_i32_0 : i32, i32
  }
  func.func @transform_2(%arg0: i32, %arg1: i32) -> (i32, i32, i32) {
    %c0_i32 = arith.constant 0 : i32
    %c0_i32_0 = arith.constant 0 : i32
    %c0_i32_1 = arith.constant 0 : i32
    return %arg0, %c0_i32, %c0_i32_0 : i32, i32, i32
  }
  func.func @transform_3(%arg0: i32, %arg1: i32) -> (i32, i32, i32) {
    %c0_i32 = arith.constant 0 : i32
    %c0_i32_0 = arith.constant 0 : i32
    %c0_i32_1 = arith.constant 0 : i32
    return %arg0, %c0_i32, %c0_i32_0 : i32, i32, i32
  }
}

</mosaic_0001>

<bundles_post_ra>
// kernel: tpu_custom_call.1
= control target key start
LH: loop header
LB: loop body
LE: loop exit
PB: predicated region body
PF: predicated region fallthrough
CT: control target
= control target key end

     0   :  { %9 = vsyncpa [#allocation5], 0  ;;  %vm1529_vm0 = vcmask 261120   ;;  %v914_v6 = vmov 0   ;;  %v915_v19 = vmov 0.0   ;;  %vm1532_vm9 = vcmask 7168   ;;  %s1525_s0 = inlined_call_operand.vmem [shape: f32[128,32], index: 0, kind: input, shape index: {}]   ;;  %s1526_s1 = inlined_call_operand.vmem [shape: s32[128,1], index: 1, kind: input, shape index: {}]   ;;  %s1527_s2 = inlined_call_operand.hbm [shape: f32[1,1,1], index: 2, kind: output, shape index: {0}]   ;;  %s1528_s3 = inlined_call_operand.hbm [shape: f32[1,1,1], index: 3, kind: output, shape index: {1}]  }
   0x1   :  { %v942_v0 = vld [vmem:[%s1525_s0 + $0x10] sm:$0xff]  ;;  %v947_v1 = vld [vmem:[%s1525_s0] sm:$0xff]  ;;  %v952_v2 = vld [vmem:[%s1525_s0 + $0x18] sm:$0xff]  ;;  %805 = vset.pattern.permute.xlu1 %v914_v6  ;;  %804 = vset.pattern.permute.xlu0 %v914_v6 }
   0x2   :  { %v130_v3 = vsel %vm1529_vm0, %v942_v0, -inf  ;;  %v124_v4 = vsel %vm1529_vm0, %v947_v1, -inf  ;;  %v961_v5 = vld [vmem:[%s1525_s0 + $0x8] sm:$0xff]  ;;  %v133_v7 = vsel %vm1529_vm0, %v952_v2, -inf  ;;  %v975_v10 = vld [vmem:[%s1525_s0 + $0x20] sm:$0xff]  ;;  %v987_v12 = vld [vmem:[%s1526_s1 + $0x10] sm:$0xff] }
   0x3   :  { %131 = vmax.xlane.f32.xlu1 %v130_v3  ;;  %125 = vmax.xlane.f32.xlu0 %v124_v4  ;;  %v127_v8 = vsel %vm1529_vm0, %v961_v5, -inf  ;;  %v970_v9 = vld [vmem:[%s1525_s0 + $0x28] sm:$0xff]  ;;  %v136_v14 = vsel %vm1529_vm0, %v975_v10, -inf  ;;  %vm499_vm4 = vcmp.eq.s32.totalorder %v987_v12, 0  ;;  %vm515_vm5 = vcmp.eq.s32.totalorder %v987_v12, 3  ;;  %v1002_v16 = vld [vmem:[%s1526_s1] sm:$0xff] }
   0x4   :  { %v980_v11 = vld [vmem:[%s1526_s1 + $0x8] sm:$0xff]  ;;  %v139_v13 = vsel %vm1529_vm0, %v970_v9, -inf  ;;  %v1007_v17 = vld [vmem:[%s1525_s0 + $0x38] sm:$0xff]  ;;  %v1012_v18 = vld [vmem:[%s1525_s0 + $0x30] sm:$0xff]  ;;  %vm497_vm6 = vcmp.eq.s32.totalorder %v1002_v16, 0  ;;  %vm513_vm7 = vcmp.eq.s32.totalorder %v1002_v16, 3 }
   0x5   :  { %vm498_vm1 = vcmp.eq.s32.totalorder %v980_v11, 0  ;;  %vm514_vm2 = vcmp.eq.s32.totalorder %v980_v11, 3  ;;  %vm1019_vm8 = vmor %vm499_vm4, %vm515_vm5  ;;  %v110_v22 = vld [vmem:[%s1526_s1 + $0x18] sm:$0xff]  ;;  %v145_v24 = vsel %vm1529_vm0, %v1007_v17, -inf  ;;  %v142_v25 = vsel %vm1529_vm0, %v1012_v18, -inf  ;;  %v111_v28 = vld [vmem:[%s1526_s1 + $0x20] sm:$0xff] }
   0x6   :  { %vm993_vm3 = vmor %vm498_vm1, %vm514_vm2  ;;  %v781_v23 = vsel %vm1019_vm8, 1.0, %v915_v19  ;;  %vm500_vm10 = vcmp.eq.s32.totalorder %v110_v22, 0  ;;  %vm516_vm11 = vcmp.eq.s32.totalorder %v110_v22, 3  ;;  %v1044_v29 = vld [vmem:[%s1525_s0 + $0x48] sm:$0xff]  ;;  %v1049_v30 = vld [vmem:[%s1525_s0 + $0x40] sm:$0xff]  ;;  %vm501_vm13 = vcmp.eq.s32.totalorder %v111_v28, 0 }
   0x7   :  { %134 = vmax.xlane.f32.xlu1 %v133_v7  ;;  %128 = vmax.xlane.f32.xlu0 %v127_v8  ;;  %v780_v20 = vsel %vm993_vm3, 1.0, %v915_v19  ;;  %vm1034_vm12 = vmor %vm497_vm6, %vm513_vm7  ;;  %vm517_vm14 = vcmp.eq.s32.totalorder %v111_v28, 3  ;;  %v691_v32 = vsel %vm1532_vm9, %v781_v23, 0.0  ;;  %v151_v37 = vsel %vm1529_vm0, %v1044_v29, -inf  ;;  %v1075_v41 = vld [vmem:[%s1525_s0 + $0x58] sm:$0xff]  ;;  %v1080_v42 = vld [vmem:[%s1525_s0 + $0x50] sm:$0xff] }
   0x8   :  { %v689_v26 = vsel %vm1532_vm9, %v780_v20, 0.0  ;;  %v779_v31 = vsel %vm1034_vm12, 1.0, %v915_v19  ;;  %vm1056_vm15 = vmor %vm500_vm10, %vm516_vm11  ;;  %v148_v38 = vsel %vm1529_vm0, %v1049_v30, -inf }
   0x9   :  { %v688_v33 = vsel %vm1532_vm9, %v779_v31, 0.0  ;;  %v782_v36 = vsel %vm1056_vm15, 1.0, %v915_v19  ;;  %vm1068_vm1 = vmor %vm501_vm13, %vm517_vm14 }
   0xa   :  { %v690_v35 = vadd.f32 %v689_v26, %v688_v33  ;;  %v693_v39 = vsel %vm1532_vm9, %v782_v36, 0.0  ;;  %v783_v44 = vsel %vm1068_vm1, 1.0, %v915_v19 }
   0xb   :  { %140 = vmax.xlane.f32.xlu1 %v139_v13  ;;  %137 = vmax.xlane.f32.xlu0 %v136_v14  ;;  %v695_v45 = vsel %vm1532_vm9, %v783_v44, 0.0 }
   0xc   :  { %v692_v43 = vadd.f32 %v691_v32, %v690_v35 }
   0xf   :  { %146 = vmax.xlane.f32.xlu1 %v145_v24  ;;  %143 = vmax.xlane.f32.xlu0 %v142_v25 }
  0x10   :  { %10 = vsyncpa [#allocation7], 0  ;;  %v694_v46 = vadd.f32 %v693_v39, %v692_v43  ;;  %v157_v47 = vsel %vm1529_vm0, %v1075_v41, -inf  ;;  %v154_v48 = vsel %vm1529_vm0, %v1080_v42, -inf  ;;  %v1093_v49 = vld [vmem:[%s1525_s0 + $0x68] sm:$0xff]  ;;  %v1098_v50 = vld [vmem:[%s1525_s0 + $0x60] sm:$0xff]  ;;  %v268_v36 = vlaneseq }
  0x11   :  { %v163_v52 = vsel %vm1529_vm0, %v1093_v49, -inf  ;;  %v160_v53 = vsel %vm1529_vm0, %v1098_v50, -inf  ;;  %v1109_v54 = vld [vmem:[%s1525_s0 + $0x78] sm:$0xff]  ;;  %v1114_v55 = vld [vmem:[%s1525_s0 + $0x70] sm:$0xff]  ;;  %v1126_v58 = vld [vmem:[%s1526_s1 + $0x48] sm:$0xff]  ;;  %s917_s22 = smov [#allocation4]  }
  0x12   :  { %v1100_v51 = vadd.f32 %v695_v45, %v694_v46  ;;  %v169_v56 = vsel %vm1529_vm0, %v1109_v54, -inf  ;;  %v166_v57 = vsel %vm1529_vm0, %v1114_v55, -inf  ;;  %v1132_v59 = vld [vmem:[%s1526_s1 + $0x58] sm:$0xff]  ;;  %v1138_v60 = vld [vmem:[%s1526_s1 + $0x28] sm:$0xff]  ;;  %v1150_v62 = vld [vmem:[%s1526_s1 + $0x30] sm:$0xff]  ;;  %s745_s23 = sshll.u32 %s917_s22, 4  ;;  %s746_s23 = int_to_ptr.vmem [resolvable:$true] %s745_s23 }
  0x13   :  { %152 = vmax.xlane.f32.xlu1 %v151_v37  ;;  %149 = vmax.xlane.f32.xlu0 %v148_v38  ;;  %v1143_v61 = vld [vmem:[%s1526_s1 + $0x68] sm:$0xff]  ;;  %v1155_v63 = vld [vmem:[%s1526_s1 + $0x78] sm:$0xff]  ;;  %v1168_v4 = vld [vmem:[%s1526_s1 + $0x40] sm:$0xff]  ;;  %s918_s24 = smov [#allocation6]   ;;  %s870_s26 = scalar_lea.vmem %s746_s23, 16 }
  0x14   :  { %v1162_v3 = vld [vmem:[%s1526_s1 + $0x38] sm:$0xff]  ;;  %v1174_v6 = vld [vmem:[%s1526_s1 + $0x50] sm:$0xff]  ;;  %v1180_v7 = vld [vmem:[%s1526_s1 + $0x60] sm:$0xff]  ;;  %s755_s25 = sshll.u32 %s918_s24, 4  ;;  %p871_p0 = scmp.ne.s32.totalorder %s746_s23, %s870_s26  ;;  %s756_s25 = int_to_ptr.vmem [resolvable:$true] %s755_s25 }
  0x15   :  { %v1186_v8 = vld [vmem:[%s1526_s1 + $0x70] sm:$0xff]  ;;  %s874_s27 = scalar_lea.vmem %s746_s23, 32  ;;  %p875_p1 = scmp.lt.s32.totalorder %s746_s23, %s746_s23 }
  0x16   :  { %p876_p2 = scmp.lt.s32.totalorder %s874_s27, %s870_s26 }
  0x17   :  { %158 = vmax.xlane.f32.xlu1 %v157_v47  ;;  %155 = vmax.xlane.f32.xlu0 %v154_v48 }
  0x18   :  { %p877_p3 = por %p876_p2, %p875_p1 }
  0x1a   :  { %p878_p4 = pnand %p877_p3, %p871_p0 }
  0x1b   :  { %164 = vmax.xlane.f32.xlu1 %v163_v52  ;;  %161 = vmax.xlane.f32.xlu0 %v160_v53 }
  0x1f   :  { %170 = vmax.xlane.f32.xlu1 %v169_v56  ;;  %167 = vmax.xlane.f32.xlu0 %v166_v57 }
  0x30   :  { %274 = vperm.xlu1 %805, %v980_v11  }
  0x34   :  { %277 = vperm.xlu1 %805, %v987_v12  }
  0x35   :  { %271 = vperm.xlu0 %804, %v1002_v16  }
  0x38   :  { %280 = vperm.xlu1 %805, %v110_v22  }
  0x39   :  { %298 = vperm.xlu0 %804, %v1126_v58  }
  0x3c   :  { %283 = vperm.xlu1 %805, %v111_v28  }
  0x3d   :  { %304 = vperm.xlu0 %804, %v1132_v59  }
  0x40   :  { %286 = vperm.xlu1 %805, %v1138_v60  }
  0x41   :  { %310 = vperm.xlu0 %804, %v1143_v61  }
  0x44   :  { %289 = vperm.xlu1 %805, %v1150_v62  }
  0x45   :  { %316 = vperm.xlu0 %804, %v1155_v63  }
  0x48   :  { %292 = vperm.xlu1 %805, %v1162_v3  }
  0x4c   :  { %295 = vperm.xlu1 %805, %v1168_v4  }
  0x50   :  { %301 = vperm.xlu1 %805, %v1174_v6  }
  0x54   :  { %307 = vperm.xlu1 %805, %v1180_v7  }
  0x58   :  { %313 = vperm.xlu1 %805, %v1186_v8  }
  0x8c   :  { %v132_v11 = vpop.xlane.xlu1 %131  ;;  %v126_v12 = vpop.xlane.xlu0 %125 }
  0x8d   :  { %v174_v32 = vsub.f32 %v942_v0, %v132_v11  ;;  %v172_v38 = vsub.f32 %v947_v1, %v126_v12 }
  0x8f   :  { %v192_v37 = vmul.f32 1.442695, %v174_v32  ;;  %v188_v46 = vmul.f32 1.442695, %v172_v38 }
  0x90   :  { %v135_v13 = vpop.xlane.xlu1 %134  ;;  %v129_v14 = vpop.xlane.xlu0 %128 }
  0x91   :  { %v173_v26 = vsub.f32 %v961_v5, %v129_v14  ;;  %v175_v45 = vsub.f32 %v952_v2, %v135_v13  ;;  %v1198_v5 = vand.u32 127, %v268_v36 }
  0x93   :  { %v190_v33 = vmul.f32 1.442695, %v173_v26  ;;  %v194_v1 = vmul.f32 1.442695, %v175_v45 }
  0x94   :  { %v141_v16 = vpop.xlane.xlu1 %140  ;;  %v138_v20 = vpop.xlane.xlu0 %137 }
  0x95   :  { %806 = vpow2.f32 %v190_v33  ;;  %v176_v43 = vsub.f32 %v975_v10, %v138_v20  ;;  %v1206_v53 = vsub.f32 %v970_v9, %v141_v16 }
  0x96   :  { %808 = vpow2.f32 %v192_v37 }
  0x97   :  { %v196_v47 = vmul.f32 1.442695, %v176_v43  ;;  %810 = vpow2.f32 %v188_v46  ;;  %v198_v12 = vmul.f32 1.442695, %v1206_v53 }
  0x98   :  { %v147_v22 = vpop.xlane.xlu1 %146  ;;  %v144_v23 = vpop.xlane.xlu0 %143 }
  0x99   :  { %v1201_v0 = vsub.f32 %v1012_v18, %v144_v23  ;;  %812 = vpow2.f32 %v196_v47  ;;  %v1218_v9 = vsub.f32 %v1007_v17, %v147_v22 }
  0x9a   :  { %814 = vpow2.f32 %v194_v1 }
  0x9b   :  { %v200_v2 = vmul.f32 1.442695, %v1201_v0  ;;  %v202_v17 = vmul.f32 1.442695, %v1218_v9 }
  0x9c   :  { %v153_v24 = vpop.xlane.xlu1 %152  ;;  %v150_v25 = vpop.xlane.xlu0 %149 }
  0x9d   :  { %v1211_v56 = vsub.f32 %v1049_v30, %v150_v25  ;;  %816 = vpow2.f32 %v200_v2  ;;  %v1229_v22 = vsub.f32 %v1044_v29, %v153_v24 }
  0x9e   :  { %818 = vpow2.f32 %v198_v12 }
  0x9f   :  { %v204_v30 = vmul.f32 1.442695, %v1211_v56  ;;  %v206_v29 = vmul.f32 1.442695, %v1229_v22 }
  0xa0   :  { %v159_v28 = vpop.xlane.xlu1 %158  ;;  %v156_v31 = vpop.xlane.xlu0 %155 }
  0xa1   :  { %v1222_v16 = vsub.f32 %v1080_v42, %v156_v31  ;;  %820 = vpow2.f32 %v204_v30 }
  0xa2   :  { %v807_v25 = vpop.eup %806  ;;  %822 = vpow2.f32 %v202_v17 }
  0xa3   :  { %v809_v31 = vpop.eup %808  ;;  %v208_v33 = vmul.f32 1.442695, %v1222_v16  ;;  %v223_v37 = vsel %vm1529_vm0, %v807_v25, 0.0 }
  0xa4   :  { %v1191_v35 = vpop.xlane.xlu1 %164  ;;  %v162_v39 = vpop.xlane.xlu0 %161 }
  0xa5   :  { %824 = vpow2.f32 %v208_v33  ;;  %v1242_v46 = vsub.f32 %v1098_v50, %v162_v39 }
  0xa6   :  { %826 = vpow2.f32 %v206_v29 }
  0xa8   :  { %v1195_v44 = vpop.xlane.xlu1 %170  ;;  %v1203_v48 = vpop.xlane.xlu0 %167 }
  0xac   :  { %v275_v52 = vpop.permute.xlu1 %274 }
  0xad   :  { %vm319_vm2 = vcmp.eq.s32.totalorder %v1198_v5, %v275_v52 }
  0xae   :  { %v335_v10 = vsel %vm319_vm2, %v173_v26, 0.0 }
  0xaf   :  { %v353_v18 = vsel %vm1529_vm0, %v335_v10, 0.0 }
  0xb0   :  { %v278_v57 = vpop.permute.xlu1 %277  ;;  %354 = vadd.xlane.f32.xlu1 %v353_v18  ;;  %v272_v11 = vpop.permute.xlu0 %271  ;;  %v212_v18 = vmul.f32 1.442695, %v1242_v46 }
  0xb1   :  { %vm320_vm4 = vcmp.eq.s32.totalorder %v1198_v5, %v278_v57  ;;  %vm318_vm5 = vcmp.eq.s32.totalorder %v1198_v5, %v272_v11 }
  0xb2   :  { %v336_v13 = vsel %vm320_vm4, %v174_v32, 0.0  ;;  %v334_v14 = vsel %vm318_vm5, %v172_v38, 0.0  ;;  %v1232_v32 = vsub.f32 %v1075_v41, %v159_v28  ;;  %v226_v41 = vsel %vm1529_vm0, %v809_v31, 0.0  ;;  %v811_v28 = vpop.eup %810 }
  0xb3   :  { %v356_v20 = vsel %vm1529_vm0, %v336_v13, 0.0  ;;  %v350_v23 = vsel %vm1529_vm0, %v334_v14, 0.0  ;;  %v813_v52 = vpop.eup %812  ;;  %v220_v2 = vsel %vm1529_vm0, %v811_v28, 0.0  ;;  %v1256_v13 = vsub.f32 %v1114_v55, %v1203_v48 }
  0xb4   :  { %v281_v26 = vpop.permute.xlu1 %280  ;;  %357 = vadd.xlane.f32.xlu1 %v356_v20  ;;  %351 = vadd.xlane.f32.xlu0 %v350_v23  ;;  %v815_v1 = vpop.eup %814  ;;  %v232_v50 = vsel %vm1529_vm0, %v813_v52, 0.0  ;;  %v1262_v20 = vsub.f32 %v1109_v54, %v1195_v44  ;;  %vm502_vm5 = vcmp.eq.s32.totalorder %v1138_v60, 0 }
  0xb5   :  { %vm321_vm6 = vcmp.eq.s32.totalorder %v1198_v5, %v281_v26  ;;  %v817_v10 = vpop.eup %816  ;;  %v229_v11 = vsel %vm1529_vm0, %v815_v1, 0.0  ;;  %v216_v23 = vmul.f32 1.442695, %v1256_v13 }
  0xb6   :  { %v337_v42 = vsel %vm321_vm6, %v175_v45, 0.0  ;;  %v210_v45 = vmul.f32 1.442695, %v1232_v32  ;;  %v819_v39 = vpop.eup %818  ;;  %v218_v17 = vmul.f32 1.442695, %v1262_v20  ;;  %vm518_vm6 = vcmp.eq.s32.totalorder %v1138_v60, 3 }
  0xb7   :  { %v359_v36 = vsel %vm1529_vm0, %v337_v42, 0.0  ;;  %v235_v14 = vsel %vm1529_vm0, %v819_v39, 0.0 }
  0xb8   :  { %v284_v38 = vpop.permute.xlu1 %283  ;;  %360 = vadd.xlane.f32.xlu1 %v359_v36  ;;  %224 = vadd.xlane.f32.xlu0 %v223_v37  ;;  %828 = vpow2.f32 %v210_v45 }
  0xb9   :  { %vm322_vm7 = vcmp.eq.s32.totalorder %v1198_v5, %v284_v38  ;;  %830 = vpow2.f32 %v212_v18  ;;  %v299_v38 = vpop.permute.xlu0 %298 }
  0xba   :  { %v338_v24 = vsel %vm322_vm7, %v176_v43, 0.0  ;;  %v1248_v43 = vsub.f32 %v1093_v49, %v1191_v35  ;;  %v238_v49 = vsel %vm1529_vm0, %v817_v10, 0.0  ;;  %v821_v35 = vpop.eup %820  ;;  %vm327_vm14 = vcmp.eq.s32.totalorder %v1198_v5, %v299_v38 }
  0xbb   :  { %v362_v47 = vsel %vm1529_vm0, %v338_v24, 0.0  ;;  %v823_v30 = vpop.eup %822  ;;  %v244_v25 = vsel %vm1529_vm0, %v821_v35, 0.0 }
  0xbc   :  { %363 = vadd.xlane.f32.xlu1 %v362_v47  ;;  %227 = vadd.xlane.f32.xlu0 %v226_v41  ;;  %v287_v57 = vpop.permute.xlu1 %286  ;;  %v214_v12 = vmul.f32 1.442695, %v1248_v43  ;;  %v825_v26 = vpop.eup %824  ;;  %v241_v42 = vsel %vm1529_vm0, %v823_v30, 0.0  ;;  %v1548_v30 = vmov 0 }
  0xbd   :  { %v827_v48 = vpop.eup %826  ;;  %v250_v31 = vsel %vm1529_vm0, %v825_v26, 0.0  ;;  %vm323_vm10 = vcmp.eq.s32.totalorder %v1198_v5, %v287_v57  ;;  %v305_v52 = vpop.permute.xlu0 %304 }
  0xbe   :  { %832 = vpow2.f32 %v214_v12  ;;  %v247_v44 = vsel %vm1529_vm0, %v827_v48, 0.0  ;;  %v339_v29 = vsel %vm323_vm10, %v1206_v53, 0.0  ;;  %vm329_vm2 = vcmp.eq.s32.totalorder %v1198_v5, %v305_v52 }
  0xbf   :  { %834 = vpow2.f32 %v216_v23  ;;  %v365_v24 = vsel %vm1529_vm0, %v339_v29, 0.0 }
  0xc0   :  { %221 = vadd.xlane.f32.xlu1 %v220_v2  ;;  %233 = vadd.xlane.f32.xlu0 %v232_v50  ;;  %v290_v55 = vpop.permute.xlu1 %289  ;;  %836 = vpow2.f32 %v218_v17 }
  0xc1   :  { %vm324_vm11 = vcmp.eq.s32.totalorder %v1198_v5, %v290_v55  ;;  %v311_v57 = vpop.permute.xlu0 %310 }
  0xc2   :  { %v340_v47 = vsel %vm324_vm11, %v1201_v0, 0.0  ;;  %vm331_vm7 = vcmp.eq.s32.totalorder %v1198_v5, %v311_v57  ;;  %vm1295_vm11 = vmor %vm502_vm5, %vm518_vm6 }
  0xc3   :  { %v368_v1 = vsel %vm1529_vm0, %v340_v47, 0.0  ;;  %v1549_v30 = vsel %vm1295_vm11, 4294967295, %v1548_v30 }
  0xc4   :  { %230 = vadd.xlane.f32.xlu1 %v229_v11  ;;  %239 = vadd.xlane.f32.xlu0 %v238_v49  ;;  %v293_v54 = vpop.permute.xlu1 %292  ;;  %v343_v11 = vsel %vm327_vm14, %v1229_v22, 0.0  ;;  %vm519_vm14 = vcmp.eq.s32.totalorder %v1150_v62, 3 }
  0xc5   :  { %v829_v33 = vpop.eup %828  ;;  %vm325_vm13 = vcmp.eq.s32.totalorder %v1198_v5, %v293_v54  ;;  %v377_v12 = vsel %vm1529_vm0, %v343_v11, 0.0  ;;  %v317_v22 = vpop.permute.xlu0 %316 }
  0xc6   :  { %v253_v36 = vsel %vm1529_vm0, %v829_v33, 0.0  ;;  %v831_v37 = vpop.eup %830  ;;  %v341_v10 = vsel %vm325_vm13, %v1218_v9, 0.0  ;;  %vm503_vm13 = vcmp.eq.s32.totalorder %v1150_v62, 0  ;;  %v1555_v62 = vmov 0 }
  0xc7   :  { %v256_v41 = vsel %vm1529_vm0, %v831_v37, 0.0  ;;  %v371_v50 = vsel %vm1529_vm0, %v341_v10, 0.0 }
  0xc8   :  { %236 = vadd.xlane.f32.xlu1 %v235_v14  ;;  %245 = vadd.xlane.f32.xlu0 %v244_v25  ;;  %v296_v45 = vpop.permute.xlu1 %295  ;;  %v345_v14 = vsel %vm329_vm2, %v1232_v32, 0.0  ;;  %vm520_vm2 = vcmp.eq.s32.totalorder %v1162_v3, 3  ;;  %v347_v32 = vsel %vm331_vm7, %v1248_v43, 0.0  ;;  %v784_v25 = vsel %vm1295_vm11, 1.0, %v915_v19  ;;  %vm1319_vm7 = vmor %vm503_vm13, %vm519_vm14 }
  0xc9   :  { %vm326_vm4 = vcmp.eq.s32.totalorder %v1198_v5, %v296_v45  ;;  %v383_v23 = vsel %vm1529_vm0, %v345_v14, 0.0  ;;  %v697_v55 = vsel %vm1532_vm9, %v784_v25, 0.0  ;;  %vm1557_vm14 = vcmp.eq.s32.totalorder %v1198_v5, %v317_v22 }
  0xca   :  { %v342_v35 = vsel %vm326_vm4, %v1211_v56, 0.0  ;;  %v698_v17 = vadd.f32 %v697_v55, %v1100_v51  ;;  %v349_v51 = vsel %vm1557_vm14, %v1262_v20, 0.0  ;;  %vm524_vm13 = vcmp.eq.s32.totalorder %v1132_v59, 3 }
  0xcb   :  { %v833_v28 = vpop.eup %832  ;;  %v374_v60 = vsel %vm1529_vm0, %v342_v35, 0.0  ;;  %vm1572_vm11 = vcmask 261120   ;;  %v1574_v45 = vmov 0 }
  0xcc   :  { %242 = vadd.xlane.f32.xlu1 %v241_v42  ;;  %251 = vadd.xlane.f32.xlu0 %v250_v31  ;;  %v259_v2 = vsel %vm1529_vm0, %v833_v28, 0.0  ;;  %v835_v53 = vpop.eup %834  ;;  %v302_v18 = vpop.permute.xlu1 %301  ;;  %v785_v42 = vsel %vm1319_vm7, 1.0, %v915_v19 }
  0xcd   :  { %v262_v39 = vsel %vm1529_vm0, %v835_v53, 0.0  ;;  %v837_v0 = vpop.eup %836  ;;  %vm328_vm10 = vcmp.eq.s32.totalorder %v1198_v5, %v302_v18  ;;  %v699_v33 = vsel %vm1532_vm9, %v785_v42, 0.0 }
  0xce   :  { %v265_v9 = vsel %vm1529_vm0, %v837_v0, 0.0  ;;  %v344_v56 = vsel %vm328_vm10, %v1222_v16, 0.0  ;;  %v1550_v16 = vmov 0  ;;  %vm1552_vm10 = vcmask 261120  }
  0xcf   :  { %v1551_v16 = vsel %vm1319_vm7, 4294967295, %v1550_v16  ;;  %v380_v43 = vsel %vm1552_vm10, %v344_v56, 0.0  ;;  %vm1553_vm5 = vmmov %vm1552_vm10  ;;  %vm1554_vm0 = vcmp.eq.s32.totalorder %v1162_v3, 0  ;;  %v700_v3 = vadd.f32 %v699_v33, %v698_v17 }
  0xd0   :  { %248 = vadd.xlane.f32.xlu1 %v247_v44  ;;  %254 = vadd.xlane.f32.xlu0 %v253_v36  ;;  %v308_v49 = vpop.permute.xlu1 %307  ;;  %v389_v48 = vsel %vm1553_vm5, %v347_v32, 0.0  ;;  %vm1333_vm4 = vmor %vm1554_vm0, %vm520_vm2  ;;  %vm1558_vm2 = vcmp.eq.s32.totalorder %v1126_v58, 3  ;;  %vm523_vm0 = vcmp.eq.s32.totalorder %v1174_v6, 3 }
  0xd1   :  { %vm330_vm6 = vcmp.eq.s32.totalorder %v1198_v5, %v308_v49  ;;  %v1556_v62 = vsel %vm1333_vm4, 4294967295, %v1555_v62  ;;  %v786_v54 = vsel %vm1333_vm4, 1.0, %v915_v19  ;;  %vm1562_vm7 = vmmov %vm1553_vm5  ;;  %vm526_vm4 = vcmp.eq.s32.totalorder %v1143_v61, 3 }
  0xd2   :  { %v346_v31 = vsel %vm330_vm6, %v1242_v46, 0.0  ;;  %v701_v44 = vsel %vm1532_vm9, %v786_v54, 0.0  ;;  %vm1559_vm6 = vcmp.eq.s32.totalorder %v1126_v58, 0  ;;  %v1560_v46 = vmov 0 }
  0xd3   :  { %vm1354_vm14 = vmor %vm1559_vm6, %vm1558_vm2  ;;  %v395_v20 = vsel %vm1562_vm7, %v349_v51, 0.0  ;;  %v702_v36 = vadd.f32 %v701_v44, %v700_v3  ;;  %vm1563_vm2 = vcmp.eq.s32.totalorder %v1168_v4, 3  ;;  %vm1564_vm6 = vcmp.eq.s32.totalorder %v1168_v4, 0 }
  0xd4   :  { %366 = vadd.xlane.f32.xlu1 %v365_v24  ;;  %257 = vadd.xlane.f32.xlu0 %v256_v41  ;;  %v314_v26 = vpop.permute.xlu1 %313  ;;  %v1561_v46 = vsel %vm1354_vm14, 4294967295, %v1560_v46  ;;  %vm1368_vm9 = vmor %vm1564_vm6, %vm1563_vm2  ;;  %v1565_v58 = vmov 0  ;;  %v788_v38 = vsel %vm1354_vm14, 1.0, %v915_v19  ;;  %vm1567_vm7 = vcmask 7168  }
  0xd5   :  { %vm332_vm10 = vcmp.eq.s32.totalorder %v1198_v5, %v314_v26  ;;  %v386_v5 = vsel %vm1553_vm5, %v346_v31, 0.0  ;;  %v1566_v58 = vsel %vm1368_vm9, 4294967295, %v1565_v58  ;;  %v787_v29 = vsel %vm1368_vm9, 1.0, %v915_v19  ;;  %vm1571_vm2 = vmmov %vm1567_vm7 }
  0xd6   :  { %v348_v37 = vsel %vm332_vm10, %v1256_v13, 0.0  ;;  %v705_v24 = vsel %vm1567_vm7, %v788_v38, 0.0  ;;  %vm1568_vm5 = vcmp.eq.s32.totalorder %v1132_v59, 0  ;;  %v703_v4 = vsel %vm1571_vm2, %v787_v29, 0.0 }
  0xd7   :  { %vm1381_vm10 = vmor %vm1568_vm5, %vm524_vm13  ;;  %vm510_vm6 = vcmp.eq.s32.totalorder %v1143_v61, 0  ;;  %v392_v41 = vsel %vm1572_vm11, %v348_v37, 0.0  ;;  %v704_v28 = vadd.f32 %v703_v4, %v702_v36  ;;  %vm1573_vm14 = vcmp.eq.s32.totalorder %v1174_v6, 0 }
  0xd8   :  { %369 = vadd.xlane.f32.xlu1 %v368_v1  ;;  %260 = vadd.xlane.f32.xlu0 %v259_v2  ;;  %vm1391_vm9 = vmor %vm1573_vm14, %vm523_vm0  ;;  %v790_v47 = vsel %vm1381_vm10, 1.0, %v915_v19  ;;  %vm509_vm11 = vcmp.eq.s32.totalorder %v1180_v7, 0  ;;  %vm525_vm7 = vcmp.eq.s32.totalorder %v1180_v7, 3  ;;  %v1578_v1 = vmov 0 }
  0xd9   :  { %v1575_v45 = vsel %vm1391_vm9, 4294967295, %v1574_v45  ;;  %v789_v59 = vsel %vm1391_vm9, 1.0, %v915_v19  ;;  %v706_v52 = vadd.f32 %v705_v24, %v704_v28  ;;  %vm1576_vm13 = vmmov %vm1571_vm2  ;;  %vm512_vm5 = vcmp.eq.s32.totalorder %v1155_v63, 0 }
  0xda   :  { %v707_v61 = vsel %vm1576_vm13, %v789_v59, 0.0  ;;  %vm1577_vm0 = vmmov %vm1571_vm2  ;;  %vm528_vm2 = vcmp.eq.s32.totalorder %v1155_v63, 3  ;;  %vm1584_vm9 = vcmask 7168  }
  0xdb   :  { %v709_v6 = vsel %vm1577_vm0, %v790_v47, 0.0  ;;  %vm1405_vm14 = vmor %vm510_vm6, %vm526_vm4  ;;  %v708_v2 = vadd.f32 %v707_v61, %v706_v52  ;;  %vm511_vm0 = vcmp.eq.s32.totalorder %v1186_v8, 0  ;;  %vm527_vm4 = vcmp.eq.s32.totalorder %v1186_v8, 3 }
  0xdc   :  { %372 = vadd.xlane.f32.xlu1 %v371_v50  ;;  %263 = vadd.xlane.f32.xlu0 %v262_v39  ;;  %v1579_v1 = vsel %vm1405_vm14, 4294967295, %v1578_v1  ;;  %v792_v53 = vsel %vm1405_vm14, 1.0, %v915_v19  ;;  %vm1414_vm13 = vmor %vm509_vm11, %vm525_vm7 }
  0xdd   :  { %v710_v7 = vadd.f32 %v709_v6, %v708_v2  ;;  %vm1420_vm6 = vmor %vm512_vm5, %vm528_vm2  ;;  %v791_v63 = vsel %vm1414_vm13, 1.0, %v915_v19 }
  0xde   :  { %v711_v50 = vsel %vm1584_vm9, %v791_v63, 0.0  ;;  %vm1585_vm14 = vmmov %vm1584_vm9  ;;  %v794_v8 = vsel %vm1420_vm6, 1.0, %v915_v19 }
  0xdf   :  { %v713_v39 = vsel %vm1585_vm14, %v792_v53, 0.0  ;;  %v712_v0 = vadd.f32 %v711_v50, %v710_v7  ;;  %vm1429_vm11 = vmor %vm511_vm0, %vm527_vm4 }
  0xe0   :  { %266 = vadd.xlane.f32.xlu0 %v265_v9  ;;  %378 = vadd.xlane.f32.xlu1 %v377_v12  ;;  %v793_v11 = vsel %vm1429_vm11, 1.0, %v915_v19  ;;  %vm1588_vm7 = vmmov %vm1584_vm9  ;;  %vm916_vm9 = vmmov 1  }
  0xe1   :  { %v714_v9 = vadd.f32 %v713_v39, %v712_v0  ;;  %v715_v12 = vsel %vm1588_vm7, %v793_v11, 0.0  ;;  %vm1589_vm5 = vmmov %vm1588_vm7 }
  0xe2   :  { %v717_v49 = vsel %vm1589_vm5, %v794_v8, 0.0  ;;  %vm562_vm14 = vmxor %vm993_vm3, %vm916_vm9 }
  0xe3   :  { %v716_v35 = vadd.f32 %v715_v12, %v714_v9  ;;  %vm563_vm2 = vmxor %vm1019_vm8, %vm916_vm9 }
  0xe4   :  { %375 = vadd.xlane.f32.xlu0 %v374_v60  ;;  %384 = vadd.xlane.f32.xlu1 %v383_v23  ;;  %vm561_vm0 = vmxor %vm1034_vm12, %vm916_vm9 }
  0xe5   :  { %v718_v14 = vadd.f32 %v717_v49, %v716_v35  ;;  %vm1453_vm3 = vmxor %vm1068_vm1, %vm916_vm9 }
  0xe6   :  { %vm564_vm8 = vmxor %vm1056_vm15, %vm916_vm9  ;;  %vm1595_vm15 = vnez %v1549_v30 }
  0xe7   :  { %vm1592_vm12 = vmmov %vm1589_vm5 }
  0xe8   :  { %381 = vadd.xlane.f32.xlu0 %v380_v43  ;;  %390 = vadd.xlane.f32.xlu1 %v389_v48  ;;  %vm1593_vm4 = vmmov %vm1589_vm5 }
  0xe9   :  { %vm1594_vm1 = vmmov %vm1593_vm4 }
  0xea   :  { %vm566_vm7 = vmxor %vm1595_vm15, %vm916_vm9  ;;  %vm1603_vm15 = vnez %v1561_v46 }
  0xeb   :  { %vm1596_vm5 = vmmov %vm1594_vm1 }
  0xec   :  { %387 = vadd.xlane.f32.xlu0 %v386_v5  ;;  %396 = vadd.xlane.f32.xlu1 %v395_v20 }
  0xf0   :  { %393 = vadd.xlane.f32.xlu0 %v392_v41  ;;  %719 = vadd.xlane.f32.xlu1 %v718_v14 }
 0x139   :  { %v355_v22 = vpop.xlane.xlu1 %354 }
 0x13d   :  { %v358_v60 = vpop.xlane.xlu1 %357  ;;  %v352_v23 = vpop.xlane.xlu0 %351 }
 0x141   :  { %v361_v56 = vpop.xlane.xlu1 %360  ;;  %v225_v32 = vpop.xlane.xlu0 %224 }
 0x142   :  { %838 = vlog2.f32 %v225_v32 }
 0x145   :  { %v364_v25 = vpop.xlane.xlu1 %363  ;;  %v228_v26 = vpop.xlane.xlu0 %227 }
 0x146   :  { %840 = vlog2.f32 %v228_v26 }
 0x149   :  { %v222_v55 = vpop.xlane.xlu1 %221  ;;  %v234_v43 = vpop.xlane.xlu0 %233 }
 0x14a   :  { %842 = vlog2.f32 %v222_v55 }
 0x14b   :  { %844 = vlog2.f32 %v234_v43 }
 0x14d   :  { %v231_v48 = vpop.xlane.xlu1 %230  ;;  %v240_v17 = vpop.xlane.xlu0 %239 }
 0x14e   :  { %846 = vlog2.f32 %v231_v48 }
 0x14f   :  { %v839_v42 = vpop.eup %838  ;;  %848 = vlog2.f32 %v240_v17 }
 0x150   :  { %v401_v33 = vmul.f32 0.6931472, %v839_v42 }
 0x151   :  { %v237_v31 = vpop.xlane.xlu1 %236  ;;  %v246_v51 = vpop.xlane.xlu0 %245 }
 0x152   :  { %850 = vlog2.f32 %v237_v31  ;;  %v431_v20 = vsub.f32 %v401_v33, %v355_v22 }
 0x153   :  { %v841_v3 = vpop.eup %840 }
 0x154   :  { %v403_v54 = vmul.f32 0.6931472, %v841_v3  ;;  %v594_v28 = vsel %vm562_vm14, %v431_v20, 0.0  ;;  %vm1597_vm14 = vnez %v1551_v16 }
 0x155   :  { %v243_v44 = vpop.xlane.xlu1 %242  ;;  %v252_v5 = vpop.xlane.xlu0 %251  ;;  %v612_v2 = vsel %vm1592_vm12, %v594_v28, 0.0 }
 0x156   :  { %852 = vlog2.f32 %v243_v44  ;;  %v432_v38 = vsub.f32 %v403_v54, %v358_v60 }
 0x157   :  { %v843_v36 = vpop.eup %842 }
 0x158   :  { %v845_v37 = vpop.eup %844  ;;  %v399_v29 = vmul.f32 0.6931472, %v843_v36  ;;  %v595_v52 = vsel %vm563_vm2, %v432_v38, 0.0  ;;  %vm567_vm2 = vmxor %vm1597_vm14, %vm916_vm9 }
 0x159   :  { %v407_v24 = vmul.f32 0.6931472, %v845_v37  ;;  %v249_v4 = vpop.xlane.xlu1 %248  ;;  %v255_v41 = vpop.xlane.xlu0 %254  ;;  %v614_v0 = vsel %vm1594_vm1, %v595_v52, 0.0 }
 0x15a   :  { %v430_v59 = vsub.f32 %v399_v29, %v352_v23  ;;  %854 = vlog2.f32 %v249_v4 }
 0x15b   :  { %v847_v47 = vpop.eup %846  ;;  %v434_v15 = vsub.f32 %v407_v24, %v364_v25  ;;  %856 = vlog2.f32 %v246_v51 }
 0x15c   :  { %v593_v61 = vsel %vm561_vm0, %v430_v59, 0.0  ;;  %v405_v6 = vmul.f32 0.6931472, %v847_v47  ;;  %v849_v27 = vpop.eup %848  ;;  %858 = vlog2.f32 %v255_v41  ;;  %vm1598_vm0 = vmmov %vm1594_vm1 }
 0x15d   :  { %v611_v53 = vsel %vm1593_vm4, %v593_v61, 0.0  ;;  %v367_v7 = vpop.xlane.xlu1 %366  ;;  %v258_v63 = vpop.xlane.xlu0 %257  ;;  %v597_v8 = vsel %vm1453_vm3, %v434_v15, 0.0  ;;  %860 = vlog2.f32 %v252_v5  ;;  %v411_v12 = vmul.f32 0.6931472, %v849_v27  ;;  %vm1599_vm3 = vmmov %vm1598_vm0 }
 0x15e   :  { %v613_v40 = vadd.f32 %v612_v2, %v611_v53  ;;  %v433_v50 = vsub.f32 %v405_v6, %v361_v56  ;;  %v618_v32 = vsel %vm1598_vm0, %v597_v8, 0.0  ;;  %vm1601_vm4 = vmmov %vm1598_vm0 }
 0x15f   :  { %v851_v39 = vpop.eup %850  ;;  %vm1602_vm1 = vmmov %vm1598_vm0 }
 0x160   :  { %v596_v11 = vsel %vm564_vm8, %v433_v50, 0.0  ;;  %v409_v9 = vmul.f32 0.6931472, %v851_v39  ;;  %v615_v34 = vadd.f32 %v614_v0, %v613_v40  ;;  %vm1600_vm8 = vnez %v1556_v62 }
 0x161   :  { %v616_v49 = vsel %vm1596_vm5, %v596_v11, 0.0  ;;  %v370_v35 = vpop.xlane.xlu1 %369  ;;  %v261_v14 = vpop.xlane.xlu0 %260  ;;  %vm568_vm12 = vmxor %vm1600_vm8, %vm916_vm9  ;;  %vm1604_vm5 = vnez %v1566_v58 }
 0x162   :  { %v435_v22 = vsub.f32 %v409_v9, %v367_v7  ;;  %v617_v60 = vadd.f32 %v616_v49, %v615_v34  ;;  %v436_v23 = vsub.f32 %v411_v12, %v370_v35  ;;  %862 = vlog2.f32 %v261_v14  ;;  %vm569_vm14 = vmxor %vm1604_vm5, %vm916_vm9 }
 0x163   :  { %v853_v56 = vpop.eup %852  ;;  %864 = vlog2.f32 %v258_v63  ;;  %vm576_vm5 = vmxor %vm1420_vm6, %vm916_vm9 }
 0x164   :  { %v598_v30 = vsel %vm566_vm7, %v435_v22, 0.0  ;;  %v619_v25 = vadd.f32 %v618_v32, %v617_v60  ;;  %v599_v26 = vsel %vm567_vm2, %v436_v23, 0.0  ;;  %v413_v55 = vmul.f32 0.6931472, %v853_v56  ;;  %vm570_vm7 = vmxor %vm1603_vm15, %vm916_vm9 }
 0x165   :  { %v620_v43 = vsel %vm1599_vm3, %v598_v30, 0.0  ;;  %v373_v16 = vpop.xlane.xlu1 %372  ;;  %v264_v48 = vpop.xlane.xlu0 %263  ;;  %v622_v51 = vsel %vm1601_vm4, %v599_v26, 0.0  ;;  %vm572_vm2 = vmxor %vm1381_vm10, %vm916_vm9  ;;  %vm1605_vm3 = vnez %v1575_v45  ;;  %vm1607_vm10 = vnez %v1579_v1 }
 0x166   :  { %v621_v17 = vadd.f32 %v620_v43, %v619_v25  ;;  %v437_v42 = vsub.f32 %v413_v55, %v373_v16  ;;  %866 = vlog2.f32 %v264_v48  ;;  %vm571_vm8 = vmxor %vm1605_vm3, %vm916_vm9  ;;  %vm84_vm3 = vcmask 0  }
 0x167   :  { %v855_v31 = vpop.eup %854  ;;  %vm574_vm4 = vmxor %vm1607_vm10, %vm916_vm9  ;;  %85 = vst.msk [vmem:[#allocation2] sm:$0x1] %vm84_vm3, %v915_v19 }
 0x168   :  { %v623_v33 = vadd.f32 %v622_v51, %v621_v17  ;;  %v600_v3 = vsel %vm568_vm12, %v437_v42, 0.0  ;;  %v417_v54 = vmul.f32 0.6931472, %v855_v31  ;;  %v857_v44 = vpop.eup %856  ;;  %vm1606_vm12 = vmmov %vm1598_vm0  ;;  %86 = vst.msk [vmem:[#allocation3] sm:$0x1] %vm84_vm3, %v915_v19 }
 0x169   :  { %v624_v5 = vsel %vm1602_vm1, %v600_v3, 0.0  ;;  %v379_v20 = vpop.xlane.xlu1 %378  ;;  %v267_v36 = vpop.xlane.xlu0 %266  ;;  %v415_v24 = vmul.f32 0.6931472, %v857_v44  ;;  %vm1608_vm1 = vmmov %vm1598_vm0 }
 0x16a   :  { %v625_v37 = vadd.f32 %v624_v5, %v623_v33  ;;  %868 = vlog2.f32 %v267_v36  ;;  %v859_v62 = vpop.eup %858  ;;  %v439_v29 = vsub.f32 %v417_v54, %v379_v20  ;;  %vm573_vm15 = vmxor %vm1414_vm13, %vm916_vm9 }
 0x16b   :  { %v861_v38 = vpop.eup %860  ;;  %v421_v28 = vmul.f32 0.6931472, %v859_v62  ;;  %vm575_vm13 = vmxor %vm1429_vm11, %vm916_vm9 }
 0x16c   :  { %v419_v15 = vmul.f32 0.6931472, %v861_v38  ;;  %v602_v52 = vsel %vm570_vm7, %v439_v29, 0.0  ;;  %vm1609_vm7 = vmmov %vm1598_vm0 }
 0x16d   :  { %v385_v4 = vpop.xlane.xlu1 %384  ;;  %v376_v41 = vpop.xlane.xlu0 %375  ;;  %v628_v63 = vsel %vm1606_vm12, %v602_v52, 0.0  ;;  %vm1612_vm6 = vmmov %vm1598_vm0 }
 0x16e   :  { %v438_v59 = vsub.f32 %v415_v24, %v376_v41  ;;  %v441_v46 = vsub.f32 %v421_v28, %v385_v4  ;;  %v609_v24 = vld [vmem:[#allocation2] sm:$0x1] }
 0x16f   :  { %v863_v47 = vpop.eup %862  ;;  %v655_v4 = vld [vmem:[#allocation3] sm:$0x1] }
 0x170   :  { %v865_v21 = vpop.eup %864  ;;  %v601_v61 = vsel %vm569_vm14, %v438_v59, 0.0  ;;  %v425_v6 = vmul.f32 0.6931472, %v863_v47  ;;  %v604_v50 = vsel %vm572_vm2, %v441_v46, 0.0  ;;  %vm1610_vm14 = vmmov %vm1598_vm0 }
 0x171   :  { %v626_v27 = vsel %vm1598_vm0, %v601_v61, 0.0  ;;  %v391_v2 = vpop.xlane.xlu1 %390  ;;  %v382_v58 = vpop.xlane.xlu0 %381  ;;  %v423_v0 = vmul.f32 0.6931472, %v865_v21  ;;  %v632_v49 = vsel %vm1609_vm7, %v604_v50, 0.0  ;;  %vm1611_vm2 = vmmov %vm1598_vm0 }
 0x172   :  { %v627_v53 = vadd.f32 %v626_v27, %v625_v37  ;;  %v440_v7 = vsub.f32 %v419_v15, %v382_v58  ;;  %v443_v40 = vsub.f32 %v425_v6, %v391_v2 }
 0x173   :  { %v867_v8 = vpop.eup %866 }
 0x174   :  { %v629_v13 = vadd.f32 %v628_v63, %v627_v53  ;;  %v603_v39 = vsel %vm571_vm8, %v440_v7, 0.0  ;;  %v606_v35 = vsel %vm574_vm4, %v443_v40, 0.0  ;;  %v427_v60 = vmul.f32 0.6931472, %v867_v8 }
 0x175   :  { %v630_v11 = vsel %vm1608_vm1, %v603_v39, 0.0  ;;  %v388_v45 = vpop.xlane.xlu0 %387  ;;  %v397_v23 = vpop.xlane.xlu1 %396  ;;  %v636_v26 = vsel %vm1611_vm2, %v606_v35, 0.0 }
 0x176   :  { %v631_v9 = vadd.f32 %v630_v11, %v629_v13  ;;  %v442_v34 = vsub.f32 %v423_v0, %v388_v45 }
 0x177   :  { %v869_v12 = vpop.eup %868 }
 0x178   :  { %v429_v1 = vmul.f32 0.6931472, %v869_v12  ;;  %v633_v14 = vadd.f32 %v632_v49, %v631_v9  ;;  %v605_v22 = vsel %vm573_vm15, %v442_v34, 0.0 }
 0x179   :  { %v634_v56 = vsel %vm1610_vm14, %v605_v22, 0.0  ;;  %v394_v10 = vpop.xlane.xlu0 %393  ;;  %v720_v57 = vpop.xlane.xlu1 %719 }
 0x17a   :  { %v445_v32 = vsub.f32 %v429_v1, %v397_v23  ;;  %v635_v30 = vadd.f32 %v634_v56, %v633_v14  ;;  %v444_v25 = vsub.f32 %v427_v60, %v394_v10  ;;  %v721_v31 = vrot.slane %v720_v57, 4 }
 0x17c   :  { %v608_v55 = vsel %vm576_vm5, %v445_v32, 0.0  ;;  %v607_v18 = vsel %vm575_vm13, %v444_v25, 0.0  ;;  %v637_v43 = vadd.f32 %v636_v26, %v635_v30  ;;  %v722_v51 = vadd.f32 %v721_v31, %v720_v57 }
 0x17d   :  { %v638_v16 = vsel %vm1612_vm6, %v607_v18, 0.0  ;;  %v640_v17 = vsel %vm1598_vm0, %v608_v55, 0.0 }
 0x17e   :  { %v639_v48 = vadd.f32 %v638_v16, %v637_v43  ;;  %v723_v33 = vrot.slane %v722_v51, 2 }
 0x180   :  { %v641_v42 = vadd.f32 %v640_v17, %v639_v48  ;;  %v724_v5 = vadd.f32 %v723_v33, %v722_v51 }
 0x182   :  { %642 = vadd.xlane.f32.xlu0 %v641_v42  ;;  %v725_v37 = vrot.slane %v724_v5, 1 }
 0x184   :  { %v726_v29 = vadd.f32 %v725_v37, %v724_v5 }
 0x20b   :  { %v643_v3 = vpop.xlane.xlu0 %642 }
 0x20c   :  { %v644_v54 = vrot.slane %v643_v3, 4 }
 0x20e   :  { %v645_v44 = vadd.f32 %v644_v54, %v643_v3 }
 0x210   :  { %v646_v20 = vrot.slane %v645_v44, 2 }
 0x212   :  { %v647_v36 = vadd.f32 %v646_v20, %v645_v44 }
 0x214   :  { %v648_v62 = vrot.slane %v647_v36, 1 }
 0x216   :  { %v649_v38 = vadd.f32 %v648_v62, %v647_v36 }
 0x218   :  { %795 = vpush %v649_v38 }
 0x219   :  { %797 = vpush %v726_v29 }
 0x249   :  { %s796_s1 = spop %795 }
 0x24a   :  { %v651_v19 = vstv %s796_s1  ;;  %s798_s21 = spop %797 }
 0x24b   :  { %v652_v41 = vadd.f32 %v651_v19, %v609_v24  ;;  %v728_v28 = vstv %s798_s21 }
 0x24c   :  { %v729_v59 = vadd.f32 %v728_v28, %v655_v4 }
 0x24d   :  { %654 = vst.msk [vmem:[#allocation2] sm:$0x1] %vm84_vm3, %v652_v41 }
 0x24e   :  { %730 = vst.msk [vmem:[#allocation3] sm:$0x1] %vm84_vm3, %v729_v59 }
 0x254   :  { %v734_v47 = vld [vmem:[#allocation2] sm:$0x1] }
 0x255   :  { %736 = vst.msk [vmem:[#allocation4] sm:$0x1] %vm84_vm3, %v734_v47  ;;  %v737_v15 = vld [vmem:[#allocation3] sm:$0x1] }
 0x256   :  { %881 = shalt.err (!%p878_p4)
}
 0x257   :  { %748 = dma.vmem_to_hbm [thread:$0]  %s746_s23, 16, %s1527_s2, [#allocation5]   ;;  %738 = vst.msk [vmem:[#allocation6] sm:$0x1] %vm84_vm3, %v737_v15 }
 0x258   :  { %s890_s29 = scalar_lea.vmem %s756_s25, 16  ;;  %s894_s30 = scalar_lea.vmem %s756_s25, 32 }
 0x259   :  { %p891_p5 = scmp.ne.s32.totalorder %s756_s25, %s890_s29  ;;  %p895_p6 = scmp.lt.s32.totalorder %s756_s25, %s756_s25 }
 0x25a   :  { %p896_p7 = scmp.lt.s32.totalorder %s894_s30, %s890_s29 }
 0x25c   :  { %p897_p8 = por %p896_p7, %p895_p6 }
 0x25e   :  { %p898_p9 = pnand %p897_p8, %p891_p5 }
 0x260   :  { %901 = shalt.err (!%p898_p9)
}
 0x261   :  { %758 = dma.vmem_to_hbm [thread:$0]  %s756_s25, 16, %s1528_s3, [#allocation7]  }
 0x262   :  { %910 = dma.done.wait [#allocation5], 16  }
 0x263   :  { %911 = vsyncadd [#allocation5], 4294967280 }
 0x264   :  { %912 = dma.done.wait [#allocation7], 16  }
 0x265   :  { %913 = vsyncadd [#allocation7], 4294967280 }
 0x266   :  { %765 = vsyncpa [#allocation5], 1 }
 0x267   :  { %766 = vsyncpa [#allocation7], 1 }

</bundles_post_ra>
